<compile_context>
chip_gen: v6e
topology: v6e:2x2x1
jax: 0.10.0
libtpu: 0.0.40
codegen_flags: <defaults>
</compile_context>

<pallas_src>
import jax
import jax.numpy as jnp
from jax.experimental import pallas as pl
from jax.experimental.pallas import tpu as pltpu


def _tp_hard_kernel(p_ref, t_ref, tp_ref, st_ref):
    """Hard (class-index) targets: per-block partial TP and sum(t)."""
    logits = p_ref[0].astype(jnp.float32)              # (C, T)
    tgt = t_ref[0]                                      # (1, T) int32
    C, T = logits.shape

    # numerically-stable softmax pieces over the class (sublane) axis
    m = jnp.max(logits, axis=0, keepdims=True)          # (1, T)
    e = jnp.exp(logits - m)                              # (C, T)
    denom = jnp.sum(e, axis=0, keepdims=True)            # (1, T)

    # in-kernel one-hot: iota over the class axis compared against the index.
    cls = jax.lax.broadcasted_iota(jnp.int32, (C, T), 0)
    onehot = (cls == tgt)                                # (C, T) bool
    num = jnp.sum(jnp.where(onehot, e, 0.0), axis=0, keepdims=True)  # (1, T)

    # only the (1, T) numerator gets divided (not the full (C, T) softmax)
    tp = jnp.sum(num / denom)
    st = jnp.sum(onehot.astype(jnp.float32))             # == #valid pixels here

    tp_ref[...] = jnp.broadcast_to(tp, tp_ref.shape)
    st_ref[...] = jnp.broadcast_to(st, st_ref.shape)


def _tp_soft_kernel(p_ref, t_ref, tp_ref, st_ref):
    """Soft (already 4-D / one-hot) targets: per-block partial TP and sum(t)."""
    logits = p_ref[0].astype(jnp.float32)                # (C, T)
    tgt = t_ref[0].astype(jnp.float32)                    # (C, T)

    m = jnp.max(logits, axis=0, keepdims=True)
    e = jnp.exp(logits - m)
    denom = jnp.sum(e, axis=0, keepdims=True)
    num = jnp.sum(e * tgt, axis=0, keepdims=True)

    tp = jnp.sum(num / denom)
    st = jnp.sum(tgt)

    tp_ref[...] = jnp.broadcast_to(tp, tp_ref.shape)
    st_ref[...] = jnp.broadcast_to(st, st_ref.shape)


def _choose_tile(hw, max_lanes):
    """Pick the lane-tile size.  Returns (tile, padded_hw)."""
    if hw <= max_lanes:
        return hw, hw                      # full-extent lane block: always legal
    t = (max_lanes // 128) * 128
    while t >= 128:                        # largest 128-multiple divisor of hw
        if hw % t == 0:
            return t, hw
        t -= 128
    tile = (max_lanes // 128) * 128        # no clean divisor: pad the lane axis
    hw_pad = ((hw + tile - 1) // tile) * tile
    return tile, hw_pad


def focal_tversky_loss(predict, targets, *, smooth=1.0, alpha=0.7, gamma=0.75,
                       max_block_bytes=2 * 1024 * 1024):
    """predict: (B, C, H, W) logits (NCHW, like PyTorch).
    targets: (B, H, W) int class indices  OR  (B, C, H, W) one-hot / soft.
    Returns (loss, loss_dict) mirroring the PyTorch module."""
    B, C, H, W = predict.shape
    HW = H * W
    n_valid = B * HW

    # ~max_block_bytes per logits block, lane count a multiple of 128
    max_lanes = max(128, (max_block_bytes // (4 * C)) // 128 * 128)
    tile, hw_pad = _choose_tile(HW, max_lanes)

    p3 = predict.reshape(B, C, HW)                     # free reshape (native layout)
    hard = (targets.ndim == 3)
    if hard:
        t3 = targets.reshape(B, 1, HW).astype(jnp.int32)
    else:
        t3 = targets.reshape(B, C, HW)

    if hw_pad != HW:                                   # rare: only if no 128-divisor
        pad = hw_pad - HW
        p3 = jnp.pad(p3, ((0, 0), (0, 0), (0, pad)))
        if hard:
            # out-of-range class index -> one-hot is all-zero -> no contribution
            t3 = jnp.pad(t3, ((0, 0), (0, 0), (0, pad)), constant_values=C)
        else:
            t3 = jnp.pad(t3, ((0, 0), (0, 0), (0, pad)))

    num_tiles = hw_pad // tile
    grid = (B, num_tiles)

    if hard:
        kernel = _tp_hard_kernel
        t_spec = pl.BlockSpec((1, 1, tile), lambda b, j: (b, 0, j))
    else:
        kernel = _tp_soft_kernel
        t_spec = pl.BlockSpec((1, C, tile), lambda b, j: (b, 0, j))

    part_shape = jax.ShapeDtypeStruct((B, num_tiles, 1, 128), jnp.float32)
    part_spec = pl.BlockSpec((1, 1, 1, 128), lambda b, j: (b, j, 0, 0))

    tp_parts, st_parts = pl.pallas_call(
        kernel,
        out_shape=(part_shape, part_shape),
        grid_spec=pltpu.PrefetchScalarGridSpec(
            num_scalar_prefetch=0,
            grid=grid,
            in_specs=[
                pl.BlockSpec((1, C, tile), lambda b, j: (b, 0, j)),
                t_spec,
            ],
            out_specs=[part_spec, part_spec],
        ),
        compiler_params=pltpu.CompilerParams(
            dimension_semantics=("parallel", "parallel")),
    )(p3, t3)

    tp = jnp.sum(tp_parts[:, :, 0, 0])
    sum_t = jnp.sum(st_parts[:, :, 0, 0])

    # softmax rows sum to 1  =>  sum(prob) over valid pixels == n_valid
    fp = jnp.float32(n_valid) - tp                     # sum((1 - t) * p)
    fn = sum_t - tp                                    # sum(t * (1 - p))

    beta = 1.0 - alpha
    tversky = (tp + smooth) / (tp + alpha * fn + beta * fp + smooth)
    loss = jnp.maximum(1.0 - tversky, 0.0) ** gamma
    # TODO(synk): PyTorch does loss.item() for the dict; kept as a device array.
    loss_dict = {"FT": loss}
    return loss, loss_dict


def _reference_loss(predict, targets, smooth=1.0, alpha=0.7, gamma=0.75):
    """Pure-JAX reference mirroring the PyTorch forward (for verification)."""
    C = predict.shape[1]
    if targets.ndim == 3:
        tgt = jnp.transpose(jax.nn.one_hot(targets.astype(jnp.int32), C,
                                           dtype=predict.dtype), (0, 3, 1, 2))
    else:
        tgt = targets.astype(predict.dtype)
    prob = jax.nn.softmax(predict, axis=1)
    p = prob.reshape(-1)
    t = tgt.reshape(-1)
    TP = jnp.sum(p * t)
    FP = jnp.sum((1 - t) * p)
    FN = jnp.sum(t * (1 - p))
    beta = 1.0 - alpha
    tversky = (TP + smooth) / (TP + alpha * FN + beta * FP + smooth)
    return (1.0 - tversky) ** gamma


if __name__ == "__main__":
    key = jax.random.PRNGKey(0)
    k_pred, k_tgt = jax.random.split(key)

    B, C, H, W = 2, 4, 16, 16
    predict = jax.random.normal(k_pred, (B, C, H, W), dtype=jnp.float32)
    targets = jax.random.randint(k_tgt, (B, H, W), 0, C, dtype=jnp.int32)

    # hard (class-index) targets
    loss, loss_dict = focal_tversky_loss(predict, targets,
                                         smooth=1.0, alpha=0.7, gamma=0.75)
    loss = jax.block_until_ready(loss)
    ref = _reference_loss(predict, targets)
    assert jnp.allclose(loss, ref, atol=1e-5, rtol=1e-5), (loss, ref)

    # soft (4-D one-hot) targets exercise the second kernel path
    tgt_4d = jnp.transpose(jax.nn.one_hot(targets, C, dtype=jnp.float32),
                           (0, 3, 1, 2))
    loss2, _ = focal_tversky_loss(predict, tgt_4d)
    loss2 = jax.block_until_ready(loss2)
    ref2 = _reference_loss(predict, tgt_4d)
    assert jnp.allclose(loss2, ref2, atol=1e-5, rtol=1e-5), (loss2, ref2)

    print("KERNEL_OK")
</pallas_src>

<mosaic_0001>
module attributes {stable_mosaic.version = 11 : i64} {
  func.func @_tp_hard_kernel(%arg0: i32, %arg1: i32, %arg2: memref<1x4x256xf32, #tpu.memory_space<vmem>>, %arg3: memref<1x1x256xi32, #tpu.memory_space<vmem>>, %arg4: memref<1x1x1x128xf32, #tpu.memory_space<vmem>>, %arg5: memref<1x1x1x128xf32, #tpu.memory_space<vmem>>) attributes {dimension_semantics = [#tpu.dimension_semantics<parallel>, #tpu.dimension_semantics<parallel>], iteration_bounds = array<i64: 2, 1>, scalar_prefetch = 0 : i64, scratch_operands = 0 : i64, tpu.core_type = #tpu.core_type<tc>, window_params = [{transform_indices = @transform_0, window_bounds = array<i64: 1, 4, 256>}, {transform_indices = @transform_1, window_bounds = array<i64: 1, 1, 256>}, {transform_indices = @transform_2, window_bounds = array<i64: 1, 1, 1, 128>}, {transform_indices = @transform_3, window_bounds = array<i64: 1, 1, 1, 128>}]} {
    %c0 = arith.constant 0 : index
    %c0_0 = arith.constant 0 : index
    %c0_1 = arith.constant 0 : index
    %0 = vector.load %arg2[%c0, %c0_0, %c0_1] : memref<1x4x256xf32, #tpu.memory_space<vmem>>, vector<1x4x256xf32>
    %1 = vector.shape_cast %0 : vector<1x4x256xf32> to vector<4x256xf32>
    %c0_2 = arith.constant 0 : index
    %c0_3 = arith.constant 0 : index
    %c0_4 = arith.constant 0 : index
    %2 = vector.load %arg3[%c0_2, %c0_3, %c0_4] : memref<1x1x256xi32, #tpu.memory_space<vmem>>, vector<1x1x256xi32>
    %3 = vector.shape_cast %2 : vector<1x1x256xi32> to vector<1x256xi32>
    %cst = arith.constant dense<0xFF800000> : vector<256xf32>
    %4 = vector.multi_reduction <maximumf>, %1, %cst [0] : vector<4x256xf32> to vector<256xf32>
    %5 = vector.shape_cast %4 : vector<256xf32> to vector<1x256xf32>
    %6 = vector.broadcast %5 : vector<1x256xf32> to vector<4x256xf32>
    %7 = arith.subf %1, %6 : vector<4x256xf32>
    %8 = math.exp %7 : vector<4x256xf32>
    %cst_5 = arith.constant dense<0.000000e+00> : vector<256xf32>
    %9 = vector.multi_reduction <add>, %8, %cst_5 [0] : vector<4x256xf32> to vector<256xf32>
    %10 = vector.shape_cast %9 : vector<256xf32> to vector<1x256xf32>
    %11 = tpu.iota {dimensions = array<i32: 0>} : vector<4x256xi32>
    %12 = vector.broadcast %3 : vector<1x256xi32> to vector<4x256xi32>
    %13 = arith.cmpi eq, %11, %12 : vector<4x256xi32>
    %cst_6 = arith.constant 0.000000e+00 : f32
    %14 = vector.broadcast %cst_6 : f32 to vector<4x256xf32>
    %15 = arith.select %13, %8, %14 : vector<4x256xi1>, vector<4x256xf32>
    %cst_7 = arith.constant dense<0.000000e+00> : vector<256xf32>
    %16 = vector.multi_reduction <add>, %15, %cst_7 [0] : vector<4x256xf32> to vector<256xf32>
    %17 = vector.shape_cast %16 : vector<256xf32> to vector<1x256xf32>
    %18 = arith.divf %17, %10 : vector<1x256xf32>
    %19 = vector.shape_cast %18 : vector<1x256xf32> to vector<1x1x256xf32>
    %cst_8 = arith.constant dense<0.000000e+00> : vector<1xf32>
    %20 = vector.multi_reduction <add>, %19, %cst_8 [1, 2] : vector<1x1x256xf32> to vector<1xf32>
    %21 = vector.shape_cast %20 : vector<1xf32> to vector<1x1x1xf32>
    %22 = vector.extract %21[0, 0, 0] : f32 from vector<1x1x1xf32>
    %23 = arith.extui %13 : vector<4x256xi1> to vector<4x256xi32>
    %24 = arith.sitofp %23 : vector<4x256xi32> to vector<4x256xf32>
    %25 = vector.shape_cast %24 : vector<4x256xf32> to vector<1x4x256xf32>
    %cst_9 = arith.constant dense<0.000000e+00> : vector<1xf32>
    %26 = vector.multi_reduction <add>, %25, %cst_9 [1, 2] : vector<1x4x256xf32> to vector<1xf32>
    %27 = vector.shape_cast %26 : vector<1xf32> to vector<1x1x1xf32>
    %28 = vector.extract %27[0, 0, 0] : f32 from vector<1x1x1xf32>
    %29 = vector.broadcast %22 : f32 to vector<1x1x1x128xf32>
    %c0_10 = arith.constant 0 : index
    %c0_11 = arith.constant 0 : index
    %c0_12 = arith.constant 0 : index
    %c0_13 = arith.constant 0 : index
    %30 = vector.load %arg4[%c0_10, %c0_11, %c0_12, %c0_13] : memref<1x1x1x128xf32, #tpu.memory_space<vmem>>, vector<1x1x1x128xf32>
    tpu.vector_store %arg4[%c0_10, %c0_11, %c0_12, %c0_13], %29 {strides = array<i32>} : memref<1x1x1x128xf32, #tpu.memory_space<vmem>>, vector<1x1x1x128xf32>,
    %31 = vector.broadcast %28 : f32 to vector<1x1x1x128xf32>
    %c0_14 = arith.constant 0 : index
    %c0_15 = arith.constant 0 : index
    %c0_16 = arith.constant 0 : index
    %c0_17 = arith.constant 0 : index
    %32 = vector.load %arg5[%c0_14, %c0_15, %c0_16, %c0_17] : memref<1x1x1x128xf32, #tpu.memory_space<vmem>>, vector<1x1x1x128xf32>
    tpu.vector_store %arg5[%c0_14, %c0_15, %c0_16, %c0_17], %31 {strides = array<i32>} : memref<1x1x1x128xf32, #tpu.memory_space<vmem>>, vector<1x1x1x128xf32>,
    return
  }
  func.func @transform_0(%arg0: i32, %arg1: i32) -> (i32, i32, i32) {
    %c0_i32 = arith.constant 0 : i32
    %c0_i32_0 = arith.constant 0 : i32
    return %arg0, %c0_i32, %arg1 : i32, i32, i32
  }
  func.func @transform_1(%arg0: i32, %arg1: i32) -> (i32, i32, i32) {
    %c0_i32 = arith.constant 0 : i32
    %c0_i32_0 = arith.constant 0 : i32
    return %arg0, %c0_i32, %arg1 : i32, i32, i32
  }
  func.func @transform_2(%arg0: i32, %arg1: i32) -> (i32, i32, i32, i32) {
    %c0_i32 = arith.constant 0 : i32
    %c0_i32_0 = arith.constant 0 : i32
    %c0_i32_1 = arith.constant 0 : i32
    return %arg0, %arg1, %c0_i32, %c0_i32_0 : i32, i32, i32, i32
  }
  func.func @transform_3(%arg0: i32, %arg1: i32) -> (i32, i32, i32, i32) {
    %c0_i32 = arith.constant 0 : i32
    %c0_i32_0 = arith.constant 0 : i32
    %c0_i32_1 = arith.constant 0 : i32
    return %arg0, %arg1, %c0_i32, %c0_i32_0 : i32, i32, i32, i32
  }
}

</mosaic_0001>

<bundles_post_ra>
// kernel: tpu_custom_call.1
= control target key start
LH: loop header
LB: loop body
LE: loop exit
PB: predicated region body
PF: predicated region fallthrough
CT: control target
= control target key end

     0   :  { %9 = vsyncpa [#allocation3], 0  ;;  %s1056_s0 = inlined_call_operand.hbm [shape: f32[2,4,256], index: 0, kind: input, shape index: {}]   ;;  %s1057_s1 = inlined_call_operand.hbm [shape: s32[2,1,256], index: 1, kind: input, shape index: {}]   ;;  %s1058_s2 = inlined_call_operand.hbm [shape: f32[2,1,1,128], index: 2, kind: output, shape index: {0}]   ;;  %s1059_s3 = inlined_call_operand.hbm [shape: f32[2,1,1,128], index: 3, kind: output, shape index: {1}]  }
   0x1   :  { %11 = vsyncpa [#allocation3 + $0x1], 0 }
   0x2   :  { %12 = vsyncpa [#allocation6], 0 }
   0x3   :  { %14 = vsyncpa [#allocation6 + $0x1], 0 }
   0x4   :  { %15 = vsyncpa [#allocation4], 0 }
   0x5   :  { %17 = vsyncpa [#allocation4 + $0x1], 0 }
   0x6   :  { %18 = vsyncpa [#allocation9], 0 }
   0x7   :  { %20 = vsyncpa [#allocation9 + $0x1], 0  ;;  %s836_s12 = smov 0   ;;  %s838_s13 = smov 0  }
   0x8   :  { %s840_s14 = smov 0   ;;  %s842_s15 = smov 0  }
   0x9   :  { %s844_s16 = smov 0   ;;  %s846_s17 = smov 0  }
   0xa LB: > { %s534_s18 = sadd.s32 4294967295, %s809_s17   ;;  %s535_s19 = sadd.s32 4294967294, %s809_s17   ;;  %s809_s17 = sphi %s846_s17, %s26_s17   ;;  %s805_s16 = sphi %s844_s16, %s1071_s16   ;;  %s801_s15 = sphi %s842_s15, %s1070_s15   ;;  %s797_s14 = sphi %s840_s14, %s1069_s14   ;;  %s793_s13 = sphi %s838_s13, %s1068_s13   ;;  %s789_s12 = sphi %s836_s12, %s1067_s12  }
   0xb   : > { %s38_s20 = sadd.s32 1, %s805_s16  ;;  %s47_s21 = sadd.s32 1, %s797_s14 }
   0xc   : > { %p40_p0 = scmp.ge.s32.totalorder %s38_s20, 2  ;;  %p54_p1 = scmp.ne.s32.totalorder %s797_s14, %s793_s13 }
   0xd   : > { %p55_p2 = scmp.eq.s32.totalorder %s809_s17, 0  ;;  %p60_p3 = scmp.ne.s32.totalorder %s793_s13, %s789_s12 }
   0xe   : > { %s1073_s20 = smov (%p40_p0, %s38_s20), 0  ;;  %p61_p5 = scmp.eq.s32.totalorder %s534_s18, 0 }
   0xf   : > { %p877_p4 = por %p55_p2, %p54_p1  ;;  %s42_s23 = ssub.s32 %s805_s16, %s1073_s20 }
  0x10   : > { %p114_p6 = scmp.eq.s32.totalorder %s534_s18, 1  ;;  %p45_p7 = scmp.eq.s32.totalorder %s42_s23, 0 }
  0x11   : > { %p883_p8 = por %p61_p5, %p60_p3  ;;  %p120_p10 = scmp.eq.s32.totalorder %s535_s19, 1 }
  0x12   : > { %p887_p9 = por %p114_p6, %p54_p1  ;;  %p581_p13 = scmp.lt.s32.totalorder %s809_s17, 2 }
  0x13   : > { %s892_s26 = scalar_select %p45_p7, %s797_s14, %s47_s21  }
  0x14   : > { %p894_p11 = por %p120_p10, %p60_p3  ;;  %s901_s28 = sand.u32 1, %s797_s14  }
  0x15   : > { %s538_s29 = sshll.u32 %s901_s28, 3  ;;  %s553_s30 = sshll.u32 %s805_s16, 7 }
  0x16   : > { %s180_s6 = scalar_lea.hbm %s1056_s0, %s553_s30  ;;  %s172_s7 = scalar_lea.vmem [#allocation2], %s538_s29 }
  0x17   : > { %s182_s8 = sshll.u32 %s172_s7, 4  ;;  %p910_p0 = pnand %p581_p13, %p877_p4  ;;  %s183_s8 = int_to_ptr.vmem [resolvable:$true] %s182_s8 }
  0x18   : > { %p544_p1 = scmp.ge.s32.totalorder %s809_s17, 1  ;;  %p208_p2 = scmp.lt.s32.totalorder %s809_s17, 3 }
  0x19   : > { %s169_s10 = scalar_lea.sflag [#allocation3], %s901_s28  ;;  %p641_p3 = pneg %p910_p0 }
  0x1a   : > { %s652_s11 = scalar_lea.vmem %s183_s8, 128  ;;  %s811_s18 = smov [#allocation2]  }
  0x1b   : > { %p653_p5 = scmp.ne.s32.totalorder %s183_s8, %s652_s11  ;;  %s657_s19 = sshll.u32 %s811_s18, 4  ;;  %s658_s19 = int_to_ptr.vmem [resolvable:$false] %s657_s19 }
  0x1c   : > { %s659_s21 = scalar_lea.vmem %s658_s19, 256  ;;  %p660_p4 = scmp.lt.s32.totalorder %s183_s8, %s658_s19 }
  0x1d   : > { %p655_p6 = pnand %p653_p5, %p641_p3  ;;  %p661_p10 = scmp.lt.s32.totalorder %s659_s21, %s652_s11 }
  0x1f   : > { %p656_p7 = pneg %p655_p6  ;;  %p662_p13 = por %p661_p10, %p660_p4 }
  0x21   : > { %p663_p12 = pnand %p662_p13, %p656_p7 }
  0x23   : > { %666 = shalt.err (!%p663_p12)
}
  0x24   : > { %570 = dma.hbm_to_vmem [thread:$0]  (!%p910_p0), %s180_s6, 128, %s183_s8, %s169_s10  }
  0x25   : > { %p928_p5 = pnand %p544_p1, %p208_p2  ;;  %s541_s23 = sshll.u32 %s901_s28, 1 }
  0x26   : > { %s554_s29 = sshll.u32 %s805_s16, 5  ;;  %s193_s7 = scalar_lea.vmem [#allocation5], %s541_s23 }
  0x27   : > { %s201_s5 = scalar_lea.hbm %s1057_s1, %s554_s29  ;;  %s203_s11 = sshll.u32 %s193_s7, 4  ;;  %s204_s11 = int_to_ptr.vmem [resolvable:$true] %s203_s11 }
  0x28   : > { %s190_s18 = scalar_lea.sflag [#allocation6], %s901_s28  ;;  %s680_s19 = scalar_lea.vmem %s204_s11, 32 }
  0x29   : > { %p681_p12 = scmp.ne.s32.totalorder %s204_s11, %s680_s19  ;;  %s812_s6 = smov [#allocation5]  }
  0x2a   : > { %s685_s8 = sshll.u32 %s812_s6, 4  ;;  %s686_s8 = int_to_ptr.vmem [resolvable:$false] %s685_s8 }
  0x2b   : > { %p683_p6 = pnand %p681_p12, %p641_p3  ;;  %s687_s10 = scalar_lea.vmem %s686_s8, 64 }
  0x2c   : > { %p688_p1 = scmp.lt.s32.totalorder %s204_s11, %s686_s8  ;;  %p689_p2 = scmp.lt.s32.totalorder %s687_s10, %s680_s19 }
  0x2d   : > { %p684_p7 = pneg %p683_p6 }
  0x2e   : > { %p690_p4 = por %p689_p2, %p688_p1 }
  0x30   : > { %p691_p10 = pnand %p690_p4, %p684_p7 }
  0x32   : > { %694 = shalt.err (!%p691_p10)
}
  0x33   : > { %573 = dma.hbm_to_vmem [thread:$0]  (!%p910_p0), %s201_s5, 32, %s204_s11, %s190_s18  }
  0x34   : > { %212 = sbr.rel (%p928_p5) target bundleno = 368 (0x170), region = 28  ;;  %s946_s28 = sand.u32 (!%p928_p5), 1, %s793_s13  }
  0x35   : > { %s545_s21 = sshll.u32 (!%p928_p5), %s946_s28, 3  ;;  %s215_s23 = scalar_lea.sflag (!%p928_p5), [#allocation3], %s946_s28 }
  0x36   : > { %s218_s29 = scalar_lea.vmem (!%p928_p5), [#allocation2], %s545_s21 }
  0x39   : > { %772 = dma.done.wait (%p883_p8), %s215_s23, 128  }
  0x3a   : > { %774 = vsyncadd (%p883_p8), %s215_s23, 4294967168  ;;  %s546_s9 = sshll.u32 %s946_s28, 1  ;;  %s224_s22 = scalar_lea.sflag [#allocation6], %s946_s28 }
  0x3b   : > { %s227_s30 = scalar_lea.vmem [#allocation5], %s546_s9 }
  0x3c   : > { %776 = dma.done.wait (%p883_p8), %s224_s22, 32  }
  0x3d   : > { %778 = vsyncadd (%p883_p8), %s224_s22, 4294967264  ;;  %vm265_vm0 = vcmask 1043456   ;;  %v260_v0 = vld [vmem:[%s218_s29] sm:$0xff]  ;;  %v304_v17 = vlaneseq  ;;  %v261_v22 = vld [vmem:[%s227_s30] sm:$0x3]  ;;  %vm336_vm3 = vcmask 1040384  }
  0x3e   : > { %v263_v1 = vcombine.high %v260_v0, %v260_v0  ;;  %v266_v2 = vsel %vm265_vm0, %v260_v0, -inf  ;;  %v813_v61 = vmov 0.0   ;;  %s549_s24 = sshll.u32 %s801_s15, 4  ;;  %s251_s4 = scalar_lea.vmem [#allocation7], %s946_s28 }
  0x3f   : > { %v267_v3 = vrot.slane %v266_v2, 4  ;;  %v305_v20 = vshrl.u32 %v304_v17, 7  ;;  %s387_s5 = sshll.u32 %s251_s4, 4  ;;  %s257_s7 = scalar_lea.vmem [#allocation8], %s946_s28  ;;  %s984_s5 = int_to_ptr.vmem [resolvable:$true] %s387_s5 }
  0x40   : > { %v273_v4 = vsel %vm265_vm0, %v263_v1, -inf  ;;  %s401_s11 = sshll.u32 %s257_s7, 4  ;;  %s982_s6 = scalar_lea.hbm %s1058_s2, %s549_s24  ;;  %s986_s11 = int_to_ptr.vmem [resolvable:$true] %s401_s11 }
  0x41   : > { %v268_v5 = vmax.f32 %v266_v2, %v267_v3  ;;  %v274_v6 = vrot.slane %v273_v4, 4  ;;  %v308_v21 = vsub.s32 0, %v305_v20  ;;  %v312_v23 = vsub.s32 1, %v305_v20  ;;  %s370_s10 = scalar_lea.sflag [#allocation4], %s946_s28  ;;  %s695_s21 = scalar_lea.vmem %s984_s5, 16 }
  0x42   : > { %p696_p8 = scmp.ne.s32.totalorder %s984_s5, %s695_s21  ;;  %s814_s23 = smov [#allocation7]  }
  0x43   : > { %v269_v7 = vrot.slane %v268_v5, 2  ;;  %v275_v8 = vmax.f32 %v273_v4, %v274_v6  ;;  %v309_v24 = vrot.slane %v261_v22, %v308_v21  ;;  %v313_v25 = vrot.slane %v261_v22, %v312_v23  ;;  %s699_s29 = sshll.u32 %s814_s23, 4  ;;  %s700_s29 = int_to_ptr.vmem [resolvable:$false] %s699_s29 }
  0x44   : > { %p697_p0 = pnand %p696_p8, %p887_p9  ;;  %s701_s9 = scalar_lea.vmem %s700_s29, 32 }
  0x45   : > { %v270_v9 = vmax.f32 %v268_v5, %v269_v7  ;;  %v276_v10 = vrot.slane %v275_v8, 2  ;;  %vm314_vm1 = vcmp.eq.s32.totalorder %v305_v20, %v309_v24  ;;  %vm315_vm2 = vcmp.eq.s32.totalorder %v305_v20, %v313_v25  ;;  %p702_p13 = scmp.lt.s32.totalorder %s984_s5, %s700_s29  ;;  %p703_p5 = scmp.lt.s32.totalorder %s701_s9, %s695_s21 }
  0x46   : > { %v547_v62 = vsel %vm314_vm1, 1.0, %v813_v61  ;;  %v548_v63 = vsel %vm315_vm2, 1.0, %v813_v61  ;;  %p698_p3 = pneg %p697_p0 }
  0x47   : > { %v271_v11 = vrot.slane %v270_v9, 1  ;;  %v277_v12 = vmax.f32 %v275_v8, %v276_v10  ;;  %v353_v3 = vsel %vm265_vm0, %v547_v62, 0.0  ;;  %v354_v4 = vsel %vm265_vm0, %v548_v63, 0.0  ;;  %p704_p12 = por %p703_p5, %p702_p13 }
  0x48   : > { %v355_v6 = vadd.f32 %v354_v4, %v353_v3 }
  0x49   : > { %v272_v13 = vmax.f32 %v270_v9, %v271_v11  ;;  %v278_v14 = vrot.slane %v277_v12, 1  ;;  %p705_p6 = pnand %p704_p12, %p698_p3 }
  0x4b   : > { %v279_v15 = vmax.f32 %v277_v12, %v278_v14 }
  0x4d   : > { %v282_v16 = vcombine.low %v272_v13, %v279_v15 }
  0x4f   : > { %v284_v18 = vsub.f32 %v260_v0, %v282_v16 }
  0x51   : > { %v285_v19 = vmul.f32 1.442695, %v284_v18 }
  0x53   : > { %633 = vpow2.f32 %v285_v19 }
  0x60   : > { %v634_v26 = vpop.eup %633 }
  0x61   : > { %v288_v27 = vcombine.high %v634_v26, %v634_v26  ;;  %v290_v28 = vsel %vm265_vm0, %v634_v26, 0.0  ;;  %v316_v29 = vsel %vm314_vm1, %v634_v26, 0.0 }
  0x62   : > { %v291_v30 = vrot.slane %v290_v28, 4  ;;  %v318_v31 = vsel %vm265_vm0, %v316_v29, 0.0 }
  0x63   : > { %v297_v32 = vsel %vm265_vm0, %v288_v27, 0.0  ;;  %v317_v33 = vsel %vm315_vm2, %v288_v27, 0.0  ;;  %v319_v36 = vrot.slane %v318_v31, 4 }
  0x64   : > { %v292_v34 = vadd.f32 %v291_v30, %v290_v28  ;;  %v298_v35 = vrot.slane %v297_v32, 4  ;;  %v325_v37 = vsel %vm265_vm0, %v317_v33, 0.0 }
  0x65   : > { %v326_v40 = vrot.slane %v325_v37, 4  ;;  %v320_v43 = vadd.f32 %v319_v36, %v318_v31 }
  0x66   : > { %v293_v38 = vrot.slane %v292_v34, 2  ;;  %v299_v39 = vadd.f32 %v298_v35, %v297_v32 }
  0x67   : > { %v327_v46 = vadd.f32 %v326_v40, %v325_v37  ;;  %v321_v49 = vrot.slane %v320_v43, 2 }
  0x68   : > { %v294_v41 = vadd.f32 %v293_v38, %v292_v34  ;;  %v300_v42 = vrot.slane %v299_v39, 2 }
  0x69   : > { %v328_v51 = vrot.slane %v327_v46, 2  ;;  %v322_v52 = vadd.f32 %v321_v49, %v320_v43 }
  0x6a   : > { %v295_v44 = vrot.slane %v294_v41, 1  ;;  %v301_v45 = vadd.f32 %v300_v42, %v299_v39 }
  0x6b   : > { %v329_v53 = vadd.f32 %v328_v51, %v327_v46  ;;  %v323_v54 = vrot.slane %v322_v52, 1 }
  0x6c   : > { %v296_v47 = vadd.f32 %v295_v44, %v294_v41  ;;  %v302_v48 = vrot.slane %v301_v45, 1 }
  0x6d   : > { %v330_v55 = vrot.slane %v329_v53, 1  ;;  %v324_v56 = vadd.f32 %v323_v54, %v322_v52 }
  0x6e   : > { %v303_v50 = vadd.f32 %v302_v48, %v301_v45  ;;  %635 = vrcp.f32 %v296_v47 }
  0x6f   : > { %v331_v57 = vadd.f32 %v330_v55, %v329_v53 }
  0x70   : > { %637 = vrcp.f32 %v303_v50 }
  0x7b   : > { %v636_v58 = vpop.eup %635 }
  0x7c   : > { %v333_v59 = vmul.f32 %v636_v58, %v324_v56 }
  0x7d   : > { %v638_v60 = vpop.eup %637 }
  0x7e   : > { %v335_v0 = vmul.f32 %v638_v60, %v331_v57  ;;  %v337_v1 = vsel %vm336_vm3, %v333_v59, 0.0 }
  0x80   : > { %v338_v2 = vsel %vm336_vm3, %v335_v0, 0.0 }
  0x81   : > { %v339_v5 = vadd.f32 %v338_v2, %v337_v1 }
  0x83   : > { %340 = vadd.xlane.f32.xlu0 %v339_v5 }
  0x87   : > { %356 = vadd.xlane.f32.xlu0 %v355_v6 }
 0x10c   : > { %v341_v7 = vpop.xlane.xlu0 %340 }
 0x10d   : > { %v342_v8 = vrot.slane %v341_v7, 4 }
 0x10f   : > { %v343_v9 = vadd.f32 %v342_v8, %v341_v7 }
 0x110   : > { %v357_v10 = vpop.xlane.xlu0 %356 }
 0x111   : > { %v344_v11 = vrot.slane %v343_v9, 2  ;;  %v358_v12 = vrot.slane %v357_v10, 4 }
 0x113   : > { %v359_v13 = vadd.f32 %v358_v12, %v357_v10  ;;  %v345_v14 = vadd.f32 %v344_v11, %v343_v9 }
 0x115   : > { %v360_v15 = vrot.slane %v359_v13, 2  ;;  %v346_v16 = vrot.slane %v345_v14, 1 }
 0x117   : > { %v361_v17 = vadd.f32 %v360_v15, %v359_v13  ;;  %v347_v18 = vadd.f32 %v346_v16, %v345_v14 }
 0x119   : > { %555 = vpush %v347_v18  ;;  %v362_v19 = vrot.slane %v361_v17, 1 }
 0x11b   : > { %v363_v20 = vadd.f32 %v362_v19, %v361_v17 }
 0x11d   : > { %557 = vpush %v363_v20 }
 0x14a   : > { %s556_s8 = spop %555 }
 0x14b   : > { %v365_v21 = vstv %s556_s8 }
 0x14c   : > { %366 = vst [vmem:[%s251_s4] sm:$0x1] %v365_v21 }
 0x14d   : > { %708 = shalt.err (!%p705_p6)
}
 0x14e   : > { %s709_s22 = scalar_lea.hbm %s982_s6, 16  ;;  %s713_s18 = scalar_lea.hbm %s1058_s2, 32 }
 0x14f   : > { %p710_p7 = scmp.ne.s32.totalorder %s982_s6, %s709_s22  ;;  %p714_p4 = scmp.lt.s32.totalorder %s982_s6, %s1058_s2 }
 0x150   : > { %p715_p10 = scmp.lt.s32.totalorder %s713_s18, %s709_s22 }
 0x151   : > { %p711_p1 = pnand %p710_p7, %p887_p9 }
 0x152   : > { %p716_p8 = por %p715_p10, %p714_p4 }
 0x153   : > { %p712_p2 = pneg %p711_p1 }
 0x155   : > { %p717_p0 = pnand %p716_p8, %p712_p2 }
 0x157   : > { %720 = shalt.err (!%p717_p0)
}
 0x158   : > { %563 = dma.vmem_to_hbm [thread:$0]  (%p887_p9), %s984_s5, 16, %s982_s6, %s370_s10  }
 0x159   : > { %s558_s21 = spop %557  ;;  %s399_s9 = scalar_lea.hbm %s1059_s3, %s549_s24 }
 0x15a   : > { %v367_v22 = vstv %s558_s21  ;;  %s374_s22 = scalar_lea.sflag [#allocation9], %s946_s28  ;;  %s721_s30 = scalar_lea.vmem %s986_s11, 16 }
 0x15b   : > { %368 = vst [vmem:[%s257_s7] sm:$0x1] %v367_v22  ;;  %p722_p3 = scmp.ne.s32.totalorder %s986_s11, %s721_s30  ;;  %s815_s4 = smov [#allocation8]  }
 0x15c   : > { %s725_s18 = sshll.u32 %s815_s4, 4  ;;  %s726_s18 = int_to_ptr.vmem [resolvable:$false] %s725_s18 }
 0x15d   : > { %p723_p13 = pnand %p722_p3, %p887_p9  ;;  %s727_s19 = scalar_lea.vmem %s726_s18, 32 }
 0x15e   : > { %p728_p12 = scmp.lt.s32.totalorder %s986_s11, %s726_s18  ;;  %p729_p6 = scmp.lt.s32.totalorder %s727_s19, %s721_s30 }
 0x15f   : > { %p724_p5 = pneg %p723_p13 }
 0x160   : > { %p730_p7 = por %p729_p6, %p728_p12 }
 0x162   : > { %p731_p1 = pnand %p730_p7, %p724_p5 }
 0x164   : > { %734 = shalt.err (!%p731_p1)
}
 0x165   : > { %s735_s15 = scalar_lea.hbm %s399_s9, 16  ;;  %s739_s5 = scalar_lea.hbm %s1059_s3, 32 }
 0x166   : > { %p736_p2 = scmp.ne.s32.totalorder %s399_s9, %s735_s15  ;;  %p740_p8 = scmp.lt.s32.totalorder %s399_s9, %s1059_s3 }
 0x167   : > { %p741_p0 = scmp.lt.s32.totalorder %s739_s5, %s735_s15 }
 0x168   : > { %p737_p4 = pnand %p736_p2, %p887_p9 }
 0x169   : > { %p742_p3 = por %p741_p0, %p740_p8 }
 0x16a   : > { %p738_p10 = pneg %p737_p4 }
 0x16c   : > { %p743_p13 = pnand %p742_p3, %p738_p10 }
 0x16e   : > { %746 = shalt.err (!%p743_p13)
}
 0x16f   : > { %564 = dma.vmem_to_hbm [thread:$0]  (%p887_p9), %s986_s11, 16, %s399_s9, %s374_s22  }
 0x170 PF: > { %s413_s10 = sand.u32 1, %s789_s12   ;;  %p1066_p5 = scmp.ge.s32.totalorder %s809_s17, 2 }
 0x171   : > { %s414_s8 = scalar_lea.sflag [#allocation4], %s413_s10 }
 0x172   : > { %p575_p12 = pnand %p1066_p5, %p894_p11 }
 0x174   : > { %p576_p6 = pneg %p575_p12 }
 0x176   : > { %780 = dma.done.wait (%p576_p6), %s414_s8, 16  }
 0x177   : > { %782 = vsyncadd (%p576_p6), %s414_s8, 4294967280  ;;  %s422_s21 = scalar_lea.sflag [#allocation9], %s413_s10 }
 0x178   : > { %784 = dma.done.wait (%p576_p6), %s422_s21, 16  }
 0x179   : > { %786 = vsyncadd (%p576_p6), %s422_s21, 4294967280  ;;  %s26_s17 = sadd.s32 1, %s809_s17   ;;  %s1067_s12 = smov %s793_s13 }
 0x17a   : > { %p23_p7 = scmp.ge.s32.totalorder %s26_s17, 4   ;;  %s1068_s13 = smov %s797_s14 }
 0x17b   : > { %s1069_s14 = smov %s892_s26  ;;  %s1070_s15 = smov %s805_s16 }
 0x17c   : > { %s1071_s16 = smov %s1073_s20  ;;  %25 = sbr.rel (!%p23_p7) target bundleno = 10 (0xa), region = 103 }
 0x181   :  { %426 = vsyncpa [#allocation3], 1 }
 0x182   :  { %428 = vsyncpa [#allocation3 + $0x1], 1 }
 0x183   :  { %429 = vsyncpa [#allocation6], 1 }
 0x184   :  { %431 = vsyncpa [#allocation6 + $0x1], 1 }
 0x185   :  { %432 = vsyncpa [#allocation4], 1 }
 0x186   :  { %434 = vsyncpa [#allocation4 + $0x1], 1 }
 0x187   :  { %435 = vsyncpa [#allocation9], 1 }
 0x188   :  { %437 = vsyncpa [#allocation9 + $0x1], 1 }

</bundles_post_ra>
